<compile_context>
chip_gen: v7x
topology: tpu7x:2x2x1
jax: 0.10.0
libtpu: 0.0.40
codegen_flags: <defaults>
</compile_context>

<pallas_src>
import jax
import jax.numpy as jnp
from jax.experimental import pallas as pl
from jax.experimental.pallas import tpu as pltpu

LATENT_DIM = 5
HIDDEN_DIM = 64
DATA_DIM = 2

MATMUL_DTYPE = jnp.bfloat16   # MXU operand dtype; accumulation stays float32


def _round_up(x, m):
    return (x + m - 1) // m * m


def _generator_kernel(z_ref, w1_ref, b1_ref, w2_ref, b2_ref, w3_ref, b3_ref,
                      out_ref):
    # z_ref: [tile_b, 5] f32; weights bf16 ([in, out]); biases f32 ([1, out]).
    # Matmuls run on the MXU with f32 accumulation; bias-add/ReLU on the VPU
    # in f32.
    z = z_ref[...].astype(MATMUL_DTYPE)

    h1 = jnp.dot(z, w1_ref[...], preferred_element_type=jnp.float32)
    h1 = jnp.maximum(h1 + b1_ref[...], 0.0)

    h2 = jnp.dot(h1.astype(MATMUL_DTYPE), w2_ref[...],
                 preferred_element_type=jnp.float32)
    h2 = jnp.maximum(h2 + b2_ref[...], 0.0)

    out = jnp.dot(h2.astype(MATMUL_DTYPE), w3_ref[...],
                  preferred_element_type=jnp.float32)
    # TODO(synk): optional in-kernel repack (tile_b,2)->(tile_b//64,128) for
    # fully unmasked vst; skipped because minor-dim reshapes are a Mosaic
    # lowering risk and HBM-side writes are already narrow (8 B/row).
    out_ref[...] = (out + b3_ref[...]).astype(out_ref.dtype)


def _prepare_params(params):
    """Cast MXU operands (weights) to bf16, keep biases in f32. No padding."""
    w1, b1, w2, b2, w3, b3 = params
    cast = lambda a: a.astype(MATMUL_DTYPE)
    return cast(w1), b1, cast(w2), b2, cast(w3), b3


def _choose_tiling(batch, tile_b):
    """Pick a batch tile: multiple of 8 (f32 sublanes), large enough to
    amortize per-step overhead, but capped so the grid keeps >= 2 steps when
    the batch allows it (v7x has 2 TensorCores; no-op on v5e/v6e)."""
    tile_b = max(8, _round_up(int(tile_b), 8))
    half = _round_up(pl.cdiv(max(int(batch), 1), 2), 8)
    tile_b = min(tile_b, max(half, 8))
    b_pad = _round_up(int(batch), tile_b)
    return tile_b, b_pad


def generator_forward(z, params, *, tile_b=8192):
    """z: [B, LATENT_DIM] float32 -> [B, DATA_DIM] float32."""
    B = z.shape[0]
    w1c, b1, w2c, b2, w3c, b3 = _prepare_params(params)

    tile_b, b_pad = _choose_tiling(B, tile_b)
    num_tiles = b_pad // tile_b

    # Only pad the batch axis (and only when needed); latent dim stays 5 and
    # the f32->bf16 cast happens in-kernel, so there is no wrapper-side
    # pad/cast pass in the common case.
    zp = z if b_pad == B else jnp.pad(z, ((0, b_pad - B), (0, 0)))

    # Weights/biases: full-array blocks with constant block index -> resident
    # in VMEM across all grid steps (total footprint ~20 KB).
    resident = lambda arr: pl.BlockSpec(arr.shape, lambda i: (0, 0))

    flops_per_row = 2 * (LATENT_DIM * HIDDEN_DIM
                         + HIDDEN_DIM * HIDDEN_DIM
                         + HIDDEN_DIM * DATA_DIM)
    param_bytes = sum(int(a.size) * a.dtype.itemsize
                      for a in (w1c, b1, w2c, b2, w3c, b3))
    cost = pl.CostEstimate(
        flops=flops_per_row * b_pad,
        transcendentals=0,
        bytes_accessed=b_pad * (LATENT_DIM + DATA_DIM) * 4 + param_bytes,
    )

    out_padded = pl.pallas_call(
        _generator_kernel,
        out_shape=jax.ShapeDtypeStruct((b_pad, DATA_DIM), jnp.float32),
        grid=(num_tiles,),
        in_specs=[
            # z tile: full last dim (5) -> satisfies the block-shape rule.
            pl.BlockSpec((tile_b, LATENT_DIM), lambda i: (i, 0)),
            resident(w1c), resident(b1),
            resident(w2c), resident(b2),
            resident(w3c), resident(b3),
        ],
        # Narrow (last dim = full DATA_DIM) output block: masked vst in VMEM,
        # but HBM writes are contiguous 8 B/row (64x less traffic than the
        # old 128-wide zero-padded output) and nothing is re-read afterwards.
        out_specs=pl.BlockSpec((tile_b, DATA_DIM), lambda i: (i, 0)),
        compiler_params=pltpu.CompilerParams(
            dimension_semantics=("parallel",),
            vmem_limit_bytes=48 * 1024 * 1024,
        ),
        cost_estimate=cost,
    )(zp, w1c, b1, w2c, b2, w3c, b3)

    return out_padded[:B] if b_pad != B else out_padded


def init_params(key):
    """Deterministic init mimicking PyTorch's nn.Linear default
    (uniform(-1/sqrt(fan_in), 1/sqrt(fan_in))). Stored as [in, out] / [1, out]."""
    keys = jax.random.split(key, 6)

    def linear(kw, kb, fan_in, fan_out):
        bound = 1.0 / jnp.sqrt(fan_in)
        w = jax.random.uniform(kw, (fan_in, fan_out), jnp.float32, -bound, bound)
        b = jax.random.uniform(kb, (1, fan_out), jnp.float32, -bound, bound)
        return w, b

    w1, b1 = linear(keys[0], keys[1], LATENT_DIM, HIDDEN_DIM)
    w2, b2 = linear(keys[2], keys[3], HIDDEN_DIM, HIDDEN_DIM)
    w3, b3 = linear(keys[4], keys[5], HIDDEN_DIM, DATA_DIM)
    return (w1, b1, w2, b2, w3, b3)


def _reference_forward_bf16(z, params):
    """Pure-JAX reference with the same bf16-operand / f32-accumulate recipe."""
    w1, b1, w2, b2, w3, b3 = params
    cast = lambda a: a.astype(MATMUL_DTYPE)
    h1 = jnp.maximum(
        jnp.dot(cast(z), cast(w1), preferred_element_type=jnp.float32) + b1, 0.0)
    h2 = jnp.maximum(
        jnp.dot(cast(h1), cast(w2), preferred_element_type=jnp.float32) + b2, 0.0)
    return jnp.dot(cast(h2), cast(w3), preferred_element_type=jnp.float32) + b3


def _reference_forward_f32(z, params):
    """Full-f32 reference (matches the PyTorch module up to bf16 contract)."""
    w1, b1, w2, b2, w3, b3 = params
    h1 = jnp.maximum(jnp.dot(z, w1, preferred_element_type=jnp.float32) + b1, 0.0)
    h2 = jnp.maximum(jnp.dot(h1, w2, preferred_element_type=jnp.float32) + b2, 0.0)
    return jnp.dot(h2, w3, preferred_element_type=jnp.float32) + b3


if __name__ == "__main__":
    key = jax.random.PRNGKey(0)
    k_params, k_z = jax.random.split(key)

    params = init_params(k_params)

    batch = 256
    z = jax.random.normal(k_z, (batch, LATENT_DIM), dtype=jnp.float32)

    # Default tile_b gets clamped to batch/2 = 128 here -> grid=(2,), which
    # exercises the pipelined multi-step path (and both TCs on v7x).
    out = generator_forward(z, params)
    out = jax.block_until_ready(out)

    assert out.shape == (batch, DATA_DIM), out.shape

    # Tight check against an identically bf16-cast reference.
    ref_bf16 = _reference_forward_bf16(z, params)
    assert jnp.allclose(out, ref_bf16, atol=1e-3, rtol=1e-3), \
        "mismatch vs bf16-cast reference"

    # Loose sanity check against the pure-f32 reference (bf16 operand contract).
    ref_f32 = _reference_forward_f32(z, params)
    assert jnp.allclose(out, ref_f32, atol=3e-2, rtol=3e-2), \
        "mismatch vs f32 reference beyond bf16 contract"

    print("KERNEL_OK")
</pallas_src>

<mosaic_0001>
module attributes {stable_mosaic.version = 11 : i64} {
  func.func @_generator_kernel(%arg0: i32, %arg1: memref<128x5xf32, #tpu.memory_space<vmem>>, %arg2: memref<5x64xbf16, #tpu.memory_space<vmem>>, %arg3: memref<1x64xf32, #tpu.memory_space<vmem>>, %arg4: memref<64x64xbf16, #tpu.memory_space<vmem>>, %arg5: memref<1x64xf32, #tpu.memory_space<vmem>>, %arg6: memref<64x2xbf16, #tpu.memory_space<vmem>>, %arg7: memref<1x2xf32, #tpu.memory_space<vmem>>, %arg8: memref<128x2xf32, #tpu.memory_space<vmem>>) attributes {dimension_semantics = [#tpu.dimension_semantics<parallel>], iteration_bounds = array<i64: 2>, scalar_prefetch = 0 : i64, scratch_operands = 0 : i64, tpu.core_type = #tpu.core_type<tc>, window_params = [{transform_indices = @transform_0, window_bounds = array<i64: 128, 5>}, {pipeline_mode = #tpu.pipeline_mode<synchronous>, transform_indices = @transform_1, window_bounds = array<i64: 5, 64>}, {pipeline_mode = #tpu.pipeline_mode<synchronous>, transform_indices = @transform_2, window_bounds = array<i64: 1, 64>}, {pipeline_mode = #tpu.pipeline_mode<synchronous>, transform_indices = @transform_3, window_bounds = array<i64: 64, 64>}, {pipeline_mode = #tpu.pipeline_mode<synchronous>, transform_indices = @transform_4, window_bounds = array<i64: 1, 64>}, {pipeline_mode = #tpu.pipeline_mode<synchronous>, transform_indices = @transform_5, window_bounds = array<i64: 64, 2>}, {pipeline_mode = #tpu.pipeline_mode<synchronous>, transform_indices = @transform_6, window_bounds = array<i64: 1, 2>}, {transform_indices = @transform_7, window_bounds = array<i64: 128, 2>}]} {
    %c0 = arith.constant 0 : index
    %c0_0 = arith.constant 0 : index
    %0 = vector.load %arg1[%c0, %c0_0] : memref<128x5xf32, #tpu.memory_space<vmem>>, vector<128x5xf32>
    %1 = arith.truncf %0 : vector<128x5xf32> to vector<128x5xbf16>
    %c0_1 = arith.constant 0 : index
    %c0_2 = arith.constant 0 : index
    %2 = vector.load %arg2[%c0_1, %c0_2] : memref<5x64xbf16, #tpu.memory_space<vmem>>, vector<5x64xbf16>
    %cst = arith.constant dense<0.000000e+00> : vector<128x64xf32>
    %3 = tpu.matmul %1, %2, %cst {dimension_numbers = #tpu.dot_dimension_numbers<[1], [0], [0], [1], [0, 0, 1, 1], [], []>} : vector<128x5xbf16>, vector<5x64xbf16>, vector<128x64xf32> -> vector<128x64xf32>
    %c0_3 = arith.constant 0 : index
    %c0_4 = arith.constant 0 : index
    %4 = vector.load %arg3[%c0_3, %c0_4] : memref<1x64xf32, #tpu.memory_space<vmem>>, vector<1x64xf32>
    %5 = vector.broadcast %4 : vector<1x64xf32> to vector<128x64xf32>
    %6 = arith.addf %3, %5 : vector<128x64xf32>
    %cst_5 = arith.constant 0.000000e+00 : f32
    %7 = vector.broadcast %cst_5 : f32 to vector<128x64xf32>
    %8 = arith.maximumf %6, %7 : vector<128x64xf32>
    %9 = arith.truncf %8 : vector<128x64xf32> to vector<128x64xbf16>
    %c0_6 = arith.constant 0 : index
    %c0_7 = arith.constant 0 : index
    %10 = vector.load %arg4[%c0_6, %c0_7] : memref<64x64xbf16, #tpu.memory_space<vmem>>, vector<64x64xbf16>
    %cst_8 = arith.constant dense<0.000000e+00> : vector<128x64xf32>
    %11 = tpu.matmul %9, %10, %cst_8 {dimension_numbers = #tpu.dot_dimension_numbers<[1], [0], [0], [1], [0, 0, 1, 1], [], []>} : vector<128x64xbf16>, vector<64x64xbf16>, vector<128x64xf32> -> vector<128x64xf32>
    %c0_9 = arith.constant 0 : index
    %c0_10 = arith.constant 0 : index
    %12 = vector.load %arg5[%c0_9, %c0_10] : memref<1x64xf32, #tpu.memory_space<vmem>>, vector<1x64xf32>
    %13 = vector.broadcast %12 : vector<1x64xf32> to vector<128x64xf32>
    %14 = arith.addf %11, %13 : vector<128x64xf32>
    %cst_11 = arith.constant 0.000000e+00 : f32
    %15 = vector.broadcast %cst_11 : f32 to vector<128x64xf32>
    %16 = arith.maximumf %14, %15 : vector<128x64xf32>
    %17 = arith.truncf %16 : vector<128x64xf32> to vector<128x64xbf16>
    %c0_12 = arith.constant 0 : index
    %c0_13 = arith.constant 0 : index
    %18 = vector.load %arg6[%c0_12, %c0_13] : memref<64x2xbf16, #tpu.memory_space<vmem>>, vector<64x2xbf16>
    %cst_14 = arith.constant dense<0.000000e+00> : vector<128x2xf32>
    %19 = tpu.matmul %17, %18, %cst_14 {dimension_numbers = #tpu.dot_dimension_numbers<[1], [0], [0], [1], [0, 0, 1, 1], [], []>} : vector<128x64xbf16>, vector<64x2xbf16>, vector<128x2xf32> -> vector<128x2xf32>
    %c0_15 = arith.constant 0 : index
    %c0_16 = arith.constant 0 : index
    %20 = vector.load %arg7[%c0_15, %c0_16] : memref<1x2xf32, #tpu.memory_space<vmem>>, vector<1x2xf32>
    %21 = vector.broadcast %20 : vector<1x2xf32> to vector<128x2xf32>
    %22 = arith.addf %19, %21 : vector<128x2xf32>
    %c0_17 = arith.constant 0 : index
    %c0_18 = arith.constant 0 : index
    %23 = vector.load %arg8[%c0_17, %c0_18] : memref<128x2xf32, #tpu.memory_space<vmem>>, vector<128x2xf32>
    tpu.vector_store %arg8[%c0_17, %c0_18], %22 {strides = array<i32>} : memref<128x2xf32, #tpu.memory_space<vmem>>, vector<128x2xf32>,
    return
  }
  func.func @transform_0(%arg0: i32) -> (i32, i32) {
    %c0_i32 = arith.constant 0 : i32
    %c0_i32_0 = arith.constant 0 : i32
    return %arg0, %c0_i32 : i32, i32
  }
  func.func @transform_1(%arg0: i32) -> (i32, i32) {
    %c0_i32 = arith.constant 0 : i32
    %c0_i32_0 = arith.constant 0 : i32
    %c0_i32_1 = arith.constant 0 : i32
    return %c0_i32, %c0_i32_0 : i32, i32
  }
  func.func @transform_2(%arg0: i32) -> (i32, i32) {
    %c0_i32 = arith.constant 0 : i32
    %c0_i32_0 = arith.constant 0 : i32
    %c0_i32_1 = arith.constant 0 : i32
    return %c0_i32, %c0_i32_0 : i32, i32
  }
  func.func @transform_3(%arg0: i32) -> (i32, i32) {
    %c0_i32 = arith.constant 0 : i32
    %c0_i32_0 = arith.constant 0 : i32
    %c0_i32_1 = arith.constant 0 : i32
    return %c0_i32, %c0_i32_0 : i32, i32
  }
  func.func @transform_4(%arg0: i32) -> (i32, i32) {
    %c0_i32 = arith.constant 0 : i32
    %c0_i32_0 = arith.constant 0 : i32
    %c0_i32_1 = arith.constant 0 : i32
    return %c0_i32, %c0_i32_0 : i32, i32
  }
  func.func @transform_5(%arg0: i32) -> (i32, i32) {
    %c0_i32 = arith.constant 0 : i32
    %c0_i32_0 = arith.constant 0 : i32
    %c0_i32_1 = arith.constant 0 : i32
    return %c0_i32, %c0_i32_0 : i32, i32
  }
  func.func @transform_6(%arg0: i32) -> (i32, i32) {
    %c0_i32 = arith.constant 0 : i32
    %c0_i32_0 = arith.constant 0 : i32
    %c0_i32_1 = arith.constant 0 : i32
    return %c0_i32, %c0_i32_0 : i32, i32
  }
  func.func @transform_7(%arg0: i32) -> (i32, i32) {
    %c0_i32 = arith.constant 0 : i32
    %c0_i32_0 = arith.constant 0 : i32
    return %arg0, %c0_i32 : i32, i32
  }
}

</mosaic_0001>

<bundles_post_ra>
// kernel: tpu_custom_call.1
= control target key start
LH: loop header
LB: loop body
LE: loop exit
PB: predicated region body
PF: predicated region fallthrough
CT: control target
= control target key end

     0   :  { %s1099_s24 = smov 0   ;;  %s1235_s0 = inlined_call_operand.vmem [shape: f32[256,5], index: 0, kind: input, shape index: {}]   ;;  %s1236_s1 = inlined_call_operand.vmem [shape: bf16[5,64], index: 1, kind: input, shape index: {}]   ;;  %s1237_s2 = inlined_call_operand.vmem [shape: f32[1,64], index: 2, kind: input, shape index: {}]   ;;  %s1238_s3 = inlined_call_operand.vmem [shape: bf16[64,64], index: 3, kind: input, shape index: {}]   ;;  %s1239_s4 = inlined_call_operand.vmem [shape: f32[1,64], index: 4, kind: input, shape index: {}]   ;;  %s1240_s5 = inlined_call_operand.vmem [shape: bf16[64,2], index: 5, kind: input, shape index: {}]   ;;  %s1241_s6 = inlined_call_operand.vmem [shape: f32[1,2], index: 6, kind: input, shape index: {}]   ;;  %s1242_s7 = inlined_call_operand.vmem [shape: f32[256,2], index: 7, kind: output, shape index: {}]  }
   0x1 LB: > { %s886_s25 = sadd.s32 4294967295, %s1056_s24   ;;  %p890_p0 = scmp.ge.s32.totalorder %s1056_s24, 1  ;;  %s1056_s24 = sphi %s1099_s24, %s17_s24  }
   0x2   : > { %p238_p1 = scmp.lt.s32.totalorder %s1056_s24, 3 }
   0x4   : > { %p239_p2 = pnand %p890_p0, %p238_p1 }
   0x5   : > { %v307_v0 = vld [vmem:[%s1236_s1] sm:$0x7] (!%p239_p2)  ;;  %vm340_vm0 = vcmask (!%p239_p2), 1041408   ;;  %vm341_vm1 = vcmask (!%p239_p2), 1042432   ;;  %s891_s28 = sshll.u32 (!%p239_p2), %s886_s25, 4  ;;  %v1058_v1 = vmov (!%p239_p2), 65535  }
   0x6   : > { %242 = sbr.rel (%p239_p2) target bundleno = 706 (0x2c2), region = 48  ;;  %v342_v2 = vsel (!%p239_p2), %vm340_vm0, 4294967295, %v1058_v1  ;;  %p271_p3 = scmp.lt.s32.totalorder (!%p239_p2), %s891_s28, 31  ;;  %v1042_v5 = vld [vmem:[%s1238_s3] sm:$0xff] (!%p239_p2)   ;;  %vm315_vm2 = vcmask (!%p239_p2), 39936   ;;  %v1043_v19 = vld [vmem:[%s1238_s3 + $0x8] sm:$0xff] (!%p239_p2)  }
   0x7   : > { %v343_v3 = vsel (!%p239_p2), %vm341_vm1, %v342_v2, 0  ;;  %v1044_v31 = vld [vmem:[%s1238_s3 + $0x10] sm:$0xff] (!%p239_p2)   ;;  %v1045_v32 = vld [vmem:[%s1238_s3 + $0x18] sm:$0xff] (!%p239_p2)   ;;  %v1046_v33 = vld [vmem:[%s1240_s5] sm:$0xff] (!%p239_p2)   ;;  %vm507_vm3 = vcmask (!%p239_p2), 523264   ;;  %vm813_vm4 = vcmask (!%p239_p2), 15360  }
   0x8   : > { %v345_v4 = vand.u32 (!%p239_p2), %v343_v3, %v307_v0  ;;  %v1047_v34 = vld [vmem:[%s1240_s5 + $0x8] sm:$0xff] (!%p239_p2)   ;;  %v895_v35 = vld [vmem:[%s1237_s2] ss:$0 sm:$0xff] (!%p239_p2) }
   0xa   : > { %965 = vmatprep.subr.bf16.mxu0 (!%p239_p2), %v345_v4  ;;  %1031 = vmatprep.subr.bf16.mxu1 (!%p239_p2), %v345_v4 }
   0xb   : > { %966 = vmatpush3.bf16.msra.mxu0 (!%p239_p2), %v345_v4  ;;  %1032 = vmatpush3.bf16.msra.mxu1 (!%p239_p2), %v345_v4 }
   0xc   : > { %983 = vmatprep.subr.bf16.mxu1 (!%p239_p2), %v1042_v5  ;;  %1007 = vmatprep.subr.bf16.mxu0 (!%p239_p2), %v1046_v33 }
   0xd   : > { %s1244_s28 = smov (!%p271_p3, %s891_s28), 31 }
   0xe   : > { %s892_s8 = sshll.u32 %s1244_s28, 3 }
   0xf   : > { %s1121_s11 = scalar_lea.vmem %s1235_s0, %s892_s8  ;;  %s1198_s14 = scalar_lea.vmem %s1242_s7, %s892_s8 }
  0x10   : > { %v283_v6 = vld [vmem:[%s1121_s11] sm:$0xff]  ;;  %v284_v7 = vld [vmem:[%s1121_s11 + $0x8] sm:$0xff]  ;;  %v285_v8 = vld [vmem:[%s1121_s11 + $0x10] sm:$0xff] }
  0x11   : > { %v299_v9 = vpack.c.bf16 %v284_v7, %v283_v6  ;;  %v286_v10 = vld [vmem:[%s1121_s11 + $0x18] sm:$0xff]  ;;  %v287_v11 = vld [vmem:[%s1121_s11 + $0x20] sm:$0xff]  ;;  %v288_v12 = vld [vmem:[%s1121_s11 + $0x28] sm:$0xff] }
  0x12   : > { %v300_v13 = vpack.c.bf16 %v286_v10, %v285_v8  ;;  %v301_v14 = vpack.c.bf16 %v288_v12, %v287_v11  ;;  %v291_v15 = vld [vmem:[%s1121_s11 + $0x40] sm:$0xff]  ;;  %v292_v16 = vld [vmem:[%s1121_s11 + $0x48] sm:$0xff]  ;;  %v293_v17 = vld [vmem:[%s1121_s11 + $0x50] sm:$0xff] }
  0x13   : > { %967 = vmatprep.mubr.msk.bf16.mxu0 %vm315_vm2, %v299_v9  ;;  %v294_v18 = vld [vmem:[%s1121_s11 + $0x58] sm:$0xff]  ;;  %v289_v20 = vld [vmem:[%s1121_s11 + $0x30] sm:$0xff]  ;;  %v303_v21 = vpack.c.bf16 %v292_v16, %v291_v15  ;;  %v295_v23 = vld [vmem:[%s1121_s11 + $0x60] sm:$0xff] }
  0x14   : > { %968 = vmatmul.mubr.msk.bf16.vlgmr.msra.gmra.mrb[0].mxu0 %vm315_vm2, %v300_v13  ;;  %v304_v22 = vpack.c.bf16 %v294_v18, %v293_v17  ;;  %v296_v24 = vld [vmem:[%s1121_s11 + $0x68] sm:$0xff]  ;;  %v290_v25 = vld [vmem:[%s1121_s11 + $0x38] sm:$0xff]  ;;  %v297_v28 = vld [vmem:[%s1121_s11 + $0x70] sm:$0xff] }
  0x15   : > { %971 = vmatprep.mubr.msk.bf16.mxu0 %vm315_vm2, %v301_v14  ;;  %v305_v26 = vpack.c.bf16 %v296_v24, %v295_v23  ;;  %975 = vmatprep.mubr.msk.bf16.mxu1 %vm315_vm2, %v303_v21  ;;  %v302_v27 = vpack.c.bf16 %v290_v25, %v289_v20  ;;  %v298_v29 = vld [vmem:[%s1121_s11 + $0x78] sm:$0xff] }
  0x16   : > { %976 = vmatmul.mubr.msk.bf16.vlgmr.msra.gmra.mrb[0].mxu1 %vm315_vm2, %v304_v22  ;;  %v306_v30 = vpack.c.bf16 %v298_v29, %v297_v28  ;;  %1008 = vmatpush3.bf16.msra.mxu0 %v1046_v33  ;;  %v1048_v28 = vld [vmem:[%s1240_s5 + $0x10] sm:$0xff]   ;;  %v1049_v29 = vld [vmem:[%s1240_s5 + $0x18] sm:$0xff]  }
  0x17   : > { %979 = vmatprep.mubr.msk.bf16.mxu1 %vm315_vm2, %v305_v26  ;;  %984 = vmatpush3.bf16.msra.mxu1 %v1042_v5 }
  0x18   : > { %985 = vmatprep.subr.bf16.mxu1 %v1043_v19  ;;  %1009 = vmatprep.subr.bf16.mxu0 %v1047_v34 }
  0x1a   : > { %1010 = vmatpush3.bf16.msra.mxu0 %v1047_v34 }
  0x1b   : > { %986 = vmatpush3.bf16.msra.mxu1 %v1043_v19  ;;  %1011 = vmatprep.subr.bf16.mxu0 %v1048_v28 }
  0x1c   : > { %972 = vmatmul.mubr.msk.bf16.gmra.mrb[4].mxu0 %vm315_vm2, %v302_v27  ;;  %987 = vmatprep.subr.bf16.mxu1 %v1044_v31 }
  0x1e   : > { %980 = vmatmul.mubr.msk.bf16.gmra.mrb[4].mxu1 %vm315_vm2, %v306_v30  ;;  %1012 = vmatpush3.bf16.msra.mxu0 %v1048_v28  ;;  %v904_v30 = vld [vmem:[%s1239_s4] ss:$0 sm:$0xff] }
  0x1f   : > { %988 = vmatpush3.bf16.msra.mxu1 %v1044_v31  ;;  %1013 = vmatprep.subr.bf16.mxu0 %v1049_v29 }
  0x20   : > { %989 = vmatprep.subr.bf16.mxu1 %v1045_v32 }
  0x22   : > { %1014 = vmatpush3.bf16.msra.mxu0 %v1049_v29 }
  0x23   : > { %990 = vmatpush3.bf16.msra.mxu1 %v1045_v32 }
  0xe7   : > { %v969_v36 = vpop.f32.mrb[0].mxu0 }
  0xe8   : > { %v390_v37 = vadd.f32 %v969_v36, %v895_v35  ;;  %v381_v38 = vpop.f32.mrb[1].mxu0 }
  0xe9   : > { %v382_v39 = vadd.f32 %v895_v35, %v381_v38  ;;  %v970_v40 = vpop.f32.mrb[2].mxu0  ;;  %v977_v43 = vpop.f32.mrb[0].mxu1 }
  0xea   : > { %v393_v41 = vadd.f32 %v970_v40, %v895_v35  ;;  %v384_v42 = vpop.f32.mrb[3].mxu0  ;;  %v422_v45 = vadd.f32 %v977_v43, %v895_v35  ;;  %v413_v46 = vpop.f32.mrb[1].mxu1  ;;  %v446_v47 = vmax.f32 %v390_v37, 0.0 }
  0xeb   : > { %v385_v44 = vadd.f32 %v895_v35, %v384_v42  ;;  %v414_v49 = vadd.f32 %v895_v35, %v413_v46  ;;  %v978_v50 = vpop.f32.mrb[2].mxu1  ;;  %v444_v51 = vmax.f32 %v382_v39, 0.0 }
  0xec   : > { %v447_v48 = vmax.f32 %v393_v41, 0.0  ;;  %v454_v53 = vmax.f32 %v422_v45, 0.0  ;;  %v425_v54 = vadd.f32 %v978_v50, %v895_v35  ;;  %v416_v55 = vpop.f32.mrb[3].mxu1 }
  0xed   : > { %v445_v52 = vmax.f32 %v385_v44, 0.0  ;;  %v452_v57 = vmax.f32 %v414_v49, 0.0  ;;  %v417_v58 = vadd.f32 %v895_v35, %v416_v55 }
  0xee   : > { %v461_v56 = vpack.c.bf16 %v447_v48, %v446_v47  ;;  %v455_v61 = vmax.f32 %v425_v54, 0.0 }
  0xef   : > { %v460_v59 = vpack.c.bf16 %v445_v52, %v444_v51  ;;  %v973_v60 = vpop.f32.mrb[4].mxu0  ;;  %v453_v0 = vmax.f32 %v417_v58, 0.0 }
  0xf0   : > { %v406_v62 = vadd.f32 %v973_v60, %v895_v35  ;;  %v397_v63 = vpop.f32.mrb[5].mxu0  ;;  %v465_v3 = vpack.c.bf16 %v455_v61, %v454_v53 }
  0xf1   : > { %v398_v1 = vadd.f32 %v895_v35, %v397_v63  ;;  %v974_v2 = vpop.f32.mrb[6].mxu0  ;;  %991 = vmatprep.mubr.msk.bf16.mxu1 %vm507_vm3, %v460_v59  ;;  %v464_v6 = vpack.c.bf16 %v453_v0, %v452_v57  ;;  %v981_v7 = vpop.f32.mrb[4].mxu1 }
  0xf2   : > { %v409_v4 = vadd.f32 %v974_v2, %v895_v35  ;;  %v400_v5 = vpop.f32.mrb[7].mxu0  ;;  %992 = vmatmul.mubr.msk.bf16.vlgmr.msra.gmra.mrb[8].mxu1 %vm507_vm3, %v461_v56  ;;  %v438_v9 = vadd.f32 %v981_v7, %v895_v35  ;;  %v429_v10 = vpop.f32.mrb[5].mxu1  ;;  %v450_v11 = vmax.f32 %v406_v62, 0.0 }
  0xf3   : > { %v401_v8 = vadd.f32 %v895_v35, %v400_v5  ;;  %v430_v13 = vadd.f32 %v895_v35, %v429_v10  ;;  %v982_v14 = vpop.f32.mrb[6].mxu1  ;;  %v448_v15 = vmax.f32 %v398_v1, 0.0 }
  0xf4   : > { %v451_v12 = vmax.f32 %v409_v4, 0.0  ;;  %v458_v17 = vmax.f32 %v438_v9, 0.0  ;;  %v441_v18 = vadd.f32 %v982_v14, %v895_v35  ;;  %v432_v19 = vpop.f32.mrb[7].mxu1 }
  0xf5   : > { %v449_v16 = vmax.f32 %v401_v8, 0.0  ;;  %v456_v21 = vmax.f32 %v430_v13, 0.0  ;;  %v433_v22 = vadd.f32 %v895_v35, %v432_v19 }
  0xf6   : > { %v463_v20 = vpack.c.bf16 %v451_v12, %v450_v11  ;;  %v459_v24 = vmax.f32 %v441_v18, 0.0 }
  0xf7   : > { %v462_v23 = vpack.c.bf16 %v449_v16, %v448_v15  ;;  %v457_v25 = vmax.f32 %v433_v22, 0.0 }
  0xf8   : > { %v467_v26 = vpack.c.bf16 %v459_v24, %v458_v17 }
  0xf9   : > { %995 = vmatprep.mubr.msk.bf16.mxu1 %vm507_vm3, %v462_v23  ;;  %v466_v27 = vpack.c.bf16 %v457_v25, %v456_v21  ;;  %v917_v23 = vld [vmem:[%s1241_s6] ss:$0 sm:$0xff] }
  0xfa   : > { %996 = vmatmul.mubr.msk.bf16.gmra.mrb[12].mxu1 %vm507_vm3, %v463_v20 }
  0xfb   : > { %999 = vmatprep.mubr.msk.bf16.mxu1 %vm507_vm3, %v464_v6 }
 0x102   : > { %1000 = vmatmul.mubr.msk.bf16.gmra.mrb[16].mxu1 %vm507_vm3, %v465_v3 }
 0x103   : > { %1003 = vmatprep.mubr.msk.bf16.mxu1 %vm507_vm3, %v466_v27 }
 0x10a   : > { %1004 = vmatmul.mubr.msk.bf16.gmra.mrb[20].mxu1 %vm507_vm3, %v467_v26 }
 0x1c5   : > { %v993_v31 = vpop.f32.mrb[8].mxu1 }
 0x1c6   : > { %v575_v32 = vadd.f32 %v993_v31, %v904_v30  ;;  %v566_v33 = vpop.f32.mrb[9].mxu1 }
 0x1c7   : > { %v567_v34 = vadd.f32 %v904_v30, %v566_v33  ;;  %v994_v35 = vpop.f32.mrb[10].mxu1 }
 0x1c8   : > { %v578_v36 = vadd.f32 %v994_v35, %v904_v30  ;;  %v569_v37 = vpop.f32.mrb[11].mxu1  ;;  %v631_v39 = vmax.f32 %v575_v32, 0.0 }
 0x1c9   : > { %v570_v38 = vadd.f32 %v904_v30, %v569_v37  ;;  %v629_v41 = vmax.f32 %v567_v34, 0.0 }
 0x1ca   : > { %v632_v40 = vmax.f32 %v578_v36, 0.0 }
 0x1cb   : > { %v630_v42 = vmax.f32 %v570_v38, 0.0 }
 0x1cc   : > { %v646_v43 = vpack.c.bf16 %v632_v40, %v631_v39 }
 0x1cd   : > { %v645_v44 = vpack.c.bf16 %v630_v42, %v629_v41  ;;  %v997_v45 = vpop.f32.mrb[12].mxu1 }
 0x1ce   : > { %v591_v46 = vadd.f32 %v997_v45, %v904_v30  ;;  %v582_v47 = vpop.f32.mrb[13].mxu1 }
 0x1cf   : > { %v583_v48 = vadd.f32 %v904_v30, %v582_v47  ;;  %v998_v49 = vpop.f32.mrb[14].mxu1  ;;  %1015 = vmatprep.mubr.msk.bf16.mxu0 %vm507_vm3, %v645_v44 }
 0x1d0   : > { %v594_v50 = vadd.f32 %v998_v49, %v904_v30  ;;  %v585_v51 = vpop.f32.mrb[15].mxu1  ;;  %1016 = vmatmul.mubr.msk.bf16.vlgmr.msra.gmra.mrb[8].mxu0 %vm507_vm3, %v646_v43  ;;  %v635_v53 = vmax.f32 %v591_v46, 0.0 }
 0x1d1   : > { %v586_v52 = vadd.f32 %v904_v30, %v585_v51  ;;  %v633_v55 = vmax.f32 %v583_v48, 0.0 }
 0x1d2   : > { %v636_v54 = vmax.f32 %v594_v50, 0.0 }
 0x1d3   : > { %v634_v56 = vmax.f32 %v586_v52, 0.0 }
 0x1d4   : > { %v648_v57 = vpack.c.bf16 %v636_v54, %v635_v53 }
 0x1d5   : > { %v647_v58 = vpack.c.bf16 %v634_v56, %v633_v55  ;;  %v1001_v59 = vpop.f32.mrb[16].mxu1 }
 0x1d6   : > { %v607_v60 = vadd.f32 %v1001_v59, %v904_v30  ;;  %v598_v61 = vpop.f32.mrb[17].mxu1 }
 0x1d7   : > { %v599_v62 = vadd.f32 %v904_v30, %v598_v61  ;;  %v1002_v63 = vpop.f32.mrb[18].mxu1  ;;  %1019 = vmatprep.mubr.msk.bf16.mxu0 %vm507_vm3, %v647_v58 }
 0x1d8   : > { %v610_v0 = vadd.f32 %v1002_v63, %v904_v30  ;;  %v601_v1 = vpop.f32.mrb[19].mxu1  ;;  %1020 = vmatmul.mubr.msk.bf16.gmra.mrb[12].mxu0 %vm507_vm3, %v648_v57  ;;  %v639_v3 = vmax.f32 %v607_v60, 0.0 }
 0x1d9   : > { %v602_v2 = vadd.f32 %v904_v30, %v601_v1  ;;  %v637_v5 = vmax.f32 %v599_v62, 0.0 }
 0x1da   : > { %v640_v4 = vmax.f32 %v610_v0, 0.0 }
 0x1db   : > { %v638_v6 = vmax.f32 %v602_v2, 0.0 }
 0x1dc   : > { %v650_v7 = vpack.c.bf16 %v640_v4, %v639_v3 }
 0x1dd   : > { %v649_v8 = vpack.c.bf16 %v638_v6, %v637_v5  ;;  %v1005_v9 = vpop.f32.mrb[20].mxu1 }
 0x1de   : > { %v623_v10 = vadd.f32 %v1005_v9, %v904_v30  ;;  %v614_v11 = vpop.f32.mrb[21].mxu1 }
 0x1df   : > { %v615_v12 = vadd.f32 %v904_v30, %v614_v11  ;;  %v1006_v13 = vpop.f32.mrb[22].mxu1  ;;  %1023 = vmatprep.mubr.msk.bf16.mxu0 %vm507_vm3, %v649_v8 }
 0x1e0   : > { %v626_v14 = vadd.f32 %v1006_v13, %v904_v30  ;;  %v617_v15 = vpop.f32.mrb[23].mxu1  ;;  %1024 = vmatmul.mubr.msk.bf16.gmra.mrb[16].mxu0 %vm507_vm3, %v650_v7  ;;  %v643_v17 = vmax.f32 %v623_v10, 0.0 }
 0x1e1   : > { %v618_v16 = vadd.f32 %v904_v30, %v617_v15  ;;  %v641_v19 = vmax.f32 %v615_v12, 0.0 }
 0x1e2   : > { %v644_v18 = vmax.f32 %v626_v14, 0.0 }
 0x1e3   : > { %v642_v20 = vmax.f32 %v618_v16, 0.0 }
 0x1e4   : > { %v652_v21 = vpack.c.bf16 %v644_v18, %v643_v17 }
 0x1e5   : > { %v651_v22 = vpack.c.bf16 %v642_v20, %v641_v19 }
 0x1e7   : > { %1027 = vmatprep.mubr.msk.bf16.mxu0 %vm507_vm3, %v651_v22 }
 0x1e8   : > { %1028 = vmatmul.mubr.msk.bf16.gmra.mrb[20].mxu0 %vm507_vm3, %v652_v21 }
 0x2a3   : > { %v1017_v24 = vpop.f32.mrb[8].mxu0 }
 0x2a4   : > { %v759_v25 = vadd.f32 %v1017_v24, %v917_v23  ;;  %v750_v26 = vpop.f32.mrb[9].mxu0 }
 0x2a5   : > { %v751_v27 = vadd.f32 %v917_v23, %v750_v26  ;;  %v1018_v28 = vpop.f32.mrb[10].mxu0 }
 0x2a6   : > { %816 = vst.msk [vmem:[%s1198_s14 + $0x10] sm:$0xff] %vm813_vm4, %v759_v25  ;;  %v762_v29 = vadd.f32 %v1018_v28, %v917_v23  ;;  %v753_v30 = vpop.f32.mrb[11].mxu0 }
 0x2a7   : > { %814 = vst.msk [vmem:[%s1198_s14] sm:$0xff] %vm813_vm4, %v751_v27  ;;  %v754_v31 = vadd.f32 %v917_v23, %v753_v30 }
 0x2a8   : > { %817 = vst.msk [vmem:[%s1198_s14 + $0x18] sm:$0xff] %vm813_vm4, %v762_v29 }
 0x2a9   : > { %815 = vst.msk [vmem:[%s1198_s14 + $0x8] sm:$0xff] %vm813_vm4, %v754_v31 }
 0x2ab   : > { %v1021_v32 = vpop.f32.mrb[12].mxu0 }
 0x2ac   : > { %v775_v33 = vadd.f32 %v1021_v32, %v917_v23  ;;  %v766_v34 = vpop.f32.mrb[13].mxu0 }
 0x2ad   : > { %v767_v35 = vadd.f32 %v917_v23, %v766_v34  ;;  %v1022_v36 = vpop.f32.mrb[14].mxu0 }
 0x2ae   : > { %820 = vst.msk [vmem:[%s1198_s14 + $0x30] sm:$0xff] %vm813_vm4, %v775_v33  ;;  %v778_v37 = vadd.f32 %v1022_v36, %v917_v23  ;;  %v769_v38 = vpop.f32.mrb[15].mxu0 }
 0x2af   : > { %818 = vst.msk [vmem:[%s1198_s14 + $0x20] sm:$0xff] %vm813_vm4, %v767_v35  ;;  %v770_v39 = vadd.f32 %v917_v23, %v769_v38 }
 0x2b0   : > { %821 = vst.msk [vmem:[%s1198_s14 + $0x38] sm:$0xff] %vm813_vm4, %v778_v37 }
 0x2b1   : > { %819 = vst.msk [vmem:[%s1198_s14 + $0x28] sm:$0xff] %vm813_vm4, %v770_v39 }
 0x2b3   : > { %v1025_v40 = vpop.f32.mrb[16].mxu0 }
 0x2b4   : > { %v791_v41 = vadd.f32 %v1025_v40, %v917_v23  ;;  %v782_v42 = vpop.f32.mrb[17].mxu0 }
 0x2b5   : > { %v783_v43 = vadd.f32 %v917_v23, %v782_v42  ;;  %v1026_v44 = vpop.f32.mrb[18].mxu0 }
 0x2b6   : > { %824 = vst.msk [vmem:[%s1198_s14 + $0x50] sm:$0xff] %vm813_vm4, %v791_v41  ;;  %v794_v45 = vadd.f32 %v1026_v44, %v917_v23  ;;  %v785_v46 = vpop.f32.mrb[19].mxu0 }
 0x2b7   : > { %822 = vst.msk [vmem:[%s1198_s14 + $0x40] sm:$0xff] %vm813_vm4, %v783_v43  ;;  %v786_v47 = vadd.f32 %v917_v23, %v785_v46 }
 0x2b8   : > { %825 = vst.msk [vmem:[%s1198_s14 + $0x58] sm:$0xff] %vm813_vm4, %v794_v45 }
 0x2b9   : > { %823 = vst.msk [vmem:[%s1198_s14 + $0x48] sm:$0xff] %vm813_vm4, %v786_v47 }
 0x2bb   : > { %v1029_v48 = vpop.f32.mrb[20].mxu0 }
 0x2bc   : > { %v807_v49 = vadd.f32 %v1029_v48, %v917_v23  ;;  %v798_v50 = vpop.f32.mrb[21].mxu0 }
 0x2bd   : > { %v799_v51 = vadd.f32 %v917_v23, %v798_v50  ;;  %v1030_v52 = vpop.f32.mrb[22].mxu0 }
 0x2be   : > { %828 = vst.msk [vmem:[%s1198_s14 + $0x70] sm:$0xff] %vm813_vm4, %v807_v49  ;;  %v810_v53 = vadd.f32 %v1030_v52, %v917_v23  ;;  %v801_v54 = vpop.f32.mrb[23].mxu0 }
 0x2bf   : > { %826 = vst.msk [vmem:[%s1198_s14 + $0x60] sm:$0xff] %vm813_vm4, %v799_v51  ;;  %v802_v55 = vadd.f32 %v917_v23, %v801_v54 }
 0x2c0   : > { %829 = vst.msk [vmem:[%s1198_s14 + $0x78] sm:$0xff] %vm813_vm4, %v810_v53 }
 0x2c1   : > { %827 = vst.msk [vmem:[%s1198_s14 + $0x68] sm:$0xff] %vm813_vm4, %v802_v55 }
 0x2c2 PF: > { %s17_s24 = sadd.s32 1, %s1056_s24  }
 0x2c3   : > { %p14_p4 = scmp.ge.s32.totalorder %s17_s24, 4  }
 0x2c5   :  { %16 = sbr.rel (!%p14_p4) target bundleno = 1 (0x1), region = 78 }

</bundles_post_ra>
